<compile_context>
chip_gen: v6e
topology: v6e:2x2x1
jax: 0.10.0
libtpu: 0.0.40
codegen_flags: <defaults>
</compile_context>

<pallas_src>
import jax
import jax.numpy as jnp
from jax.experimental import pallas as pl
from jax.experimental.pallas import tpu as pltpu

_LANE = 128

# Per-grid-step budget for (input + output) bytes.  8 MiB combined =>
# f32->f32: 4 MiB in + 4 MiB out; int8->f32: ~1.6 MiB in + ~6.4 MiB out.
# Double-buffered (<= 16 MiB) this stays inside the explicit VMEM limit below.
_STEP_BYTES = 8 * 1024 * 1024
_VMEM_LIMIT_BYTES = 40 * 1024 * 1024

# Below this many combined (in + out) bytes, a plain fused XLA multiply beats
# the pallas_call launch + per-step overhead for a pure streaming op.
_MIN_PALLAS_BYTES = 512 * 1024


def _dequant_kernel(scale_ref, x_ref, o_ref):
    # scale_ref: (1, 1) scalar in SMEM; x_ref/o_ref: (block_rows, 128) in VMEM.
    s = scale_ref[0, 0]
    o_ref[...] = (x_ref[...].astype(s.dtype) * s).astype(o_ref.dtype)


def _dequant_2d(x2d, scale_smem, out_dtype, block_rows, grid, *, alias_input):
    rows, lane = x2d.shape
    in_bytes = rows * lane * jnp.dtype(x2d.dtype).itemsize
    out_bytes = rows * lane * jnp.dtype(out_dtype).itemsize
    return pl.pallas_call(
        _dequant_kernel,
        out_shape=jax.ShapeDtypeStruct((rows, lane), out_dtype),
        grid_spec=pltpu.PrefetchScalarGridSpec(
            num_scalar_prefetch=0,
            grid=grid,
            in_specs=[
                pl.BlockSpec(memory_space=pltpu.SMEM),               # scale scalar
                pl.BlockSpec((block_rows, lane), lambda i: (i, 0)),  # x tile
            ],
            out_specs=pl.BlockSpec((block_rows, lane), lambda i: (i, 0)),
        ),
        compiler_params=pltpu.CompilerParams(
            dimension_semantics=("parallel",),
            vmem_limit_bytes=_VMEM_LIMIT_BYTES,
        ),
        cost_estimate=pl.CostEstimate(
            flops=rows * lane,
            transcendentals=0,
            bytes_accessed=in_bytes + out_bytes,
        ),
        input_output_aliases=({1: 0} if alias_input else {}),
    )(scale_smem, x2d)


def dequant(x: jax.Array, scale, *,
            min_pallas_bytes: int = _MIN_PALLAS_BYTES,
            donate_input: bool = False) -> jax.Array:
    """Elementwise x * scale (per-tensor scalar scale), matching DeQuant.forward."""
    orig_shape = x.shape
    scale_arr = jnp.asarray(scale)
    out_dtype = jnp.result_type(x.dtype, scale_arr.dtype)

    # Non-scalar (broadcasting) scale: keep module semantics with plain XLA.
    if scale_arr.size != 1:
        return (x * scale_arr).astype(out_dtype)

    # Compute dtype: f32 for float results (proper dequant upcast for int8/u8
    # inputs with a float scale), i32 for pure-integer inputs.
    acc_dtype = jnp.float32 if jnp.issubdtype(out_dtype, jnp.floating) else jnp.int32
    scale_acc = scale_arr.reshape(()).astype(acc_dtype)

    flat = x.reshape(-1)
    n = flat.shape[0]
    if n == 0:
        return flat.astype(out_dtype).reshape(orig_shape)

    in_itemsize = jnp.dtype(x.dtype).itemsize
    out_itemsize = jnp.dtype(out_dtype).itemsize

    # Small-tensor fast path: launch overhead would dominate a streaming kernel.
    if n * (in_itemsize + out_itemsize) < min_pallas_bytes:
        return (flat.astype(acc_dtype) * scale_acc).astype(out_dtype).reshape(orig_shape)

    # Lane-aligned prefix goes through the kernel; any <128-element tail is
    # handled below (rare for real activation shapes).
    n_main = (n // _LANE) * _LANE
    rows = n_main // _LANE

    outs = []
    if rows > 0:
        # Dtype-aware minimum sublane count: 8 (4B) / 16 (2B) / 32 (1B).
        sub_min = max(8, 32 // max(min(in_itemsize, out_itemsize), 1))
        # Budget the tile on combined in+out bytes; keep rows a multiple of 32
        # so the block is valid for every dtype width.
        rows_tile = max(
            sub_min,
            (_STEP_BYTES // (_LANE * (in_itemsize + out_itemsize))) // 32 * 32,
        )

        x2d = (flat if n_main == n else flat[:n_main]).reshape(rows, _LANE)
        if rows <= rows_tile:
            block_rows, grid = rows, (1,)          # full-extent block: always legal
        else:
            block_rows, grid = rows_tile, (pl.cdiv(rows, rows_tile),)  # ragged last block masked

        alias = bool(donate_input) and jnp.dtype(x2d.dtype) == jnp.dtype(out_dtype)
        out2d = _dequant_2d(
            x2d, scale_acc.reshape(1, 1), out_dtype, block_rows, grid,
            alias_input=alias,
        )
        outs.append(out2d.reshape(-1))

    if n_main < n:
        # Only reached for large tensors whose element count is not a multiple
        # of 128.
        # TODO(synk): folding this tail into the kernel (masked final-row
        # store) needs a 1-D / manual-DMA formulation; the concat below costs
        # one extra output pass only for such shapes.
        tail = flat[n_main:]
        outs.append((tail.astype(acc_dtype) * scale_acc).astype(out_dtype))

    out_flat = outs[0] if len(outs) == 1 else jnp.concatenate(outs)
    return out_flat.reshape(orig_shape)


if __name__ == "__main__":
    key = jax.random.PRNGKey(0)
    kx, ks, kq, kb = jax.random.split(key, 4)

    # Per-tensor dequantization scale (scalar), as DeQuant.forward expects.
    scale = jax.random.uniform(ks, (), dtype=jnp.float32, minval=0.1, maxval=2.0)

    # 1) Small NCHW conv-style activation: exercises the small-tensor fast path.
    x_small = jax.random.normal(kx, (2, 4, 16, 16), dtype=jnp.float32)
    out_small = dequant(x_small, scale)
    jax.block_until_ready(out_small)
    ref_small = x_small * scale
    assert out_small.shape == ref_small.shape and out_small.dtype == ref_small.dtype
    assert jnp.allclose(out_small, ref_small, rtol=1e-6, atol=1e-6)

    # 2) Same tensor forced through the Pallas kernel (single-block grid).
    out_kernel = dequant(x_small, scale, min_pallas_bytes=0)
    jax.block_until_ready(out_kernel)
    assert jnp.allclose(out_kernel, ref_small, rtol=1e-6, atol=1e-6)

    # 3) int8 activations + float per-tensor scale: dequant promotion to f32.
    x_q = jax.random.randint(kq, (2, 4, 32, 16), -128, 128, dtype=jnp.int8)
    out_q = dequant(x_q, scale, min_pallas_bytes=0)
    jax.block_until_ready(out_q)
    ref_q = x_q.astype(jnp.float32) * scale
    assert out_q.dtype == jnp.float32
    assert jnp.allclose(out_q, ref_q, rtol=1e-6, atol=1e-6)

    # 4) Multi-block grid with a ragged last block (rows=8200 > rows_tile=8192).
    x_big = jax.random.normal(kb, (25, 41, 32, 32), dtype=jnp.float32)
    out_big = dequant(x_big, scale)
    jax.block_until_ready(out_big)
    ref_big = x_big * scale
    assert jnp.allclose(out_big, ref_big, rtol=1e-6, atol=1e-6)

    print("KERNEL_OK")
</pallas_src>

<mosaic_0001>
module attributes {stable_mosaic.version = 11 : i64} {
  func.func @_dequant_kernel(%arg0: i32, %arg1: memref<1x1xf32, #tpu.memory_space<smem>>, %arg2: memref<16x128xf32, #tpu.memory_space<vmem>>, %arg3: memref<16x128xf32, #tpu.memory_space<vmem>>) attributes {dimension_semantics = [#tpu.dimension_semantics<parallel>], iteration_bounds = array<i64: 1>, scalar_prefetch = 0 : i64, scratch_operands = 0 : i64, tpu.core_type = #tpu.core_type<tc>, window_params = [{transform_indices = @transform_0, window_bounds = array<i64: 1, 1>}, {transform_indices = @transform_1, window_bounds = array<i64: 16, 128>}, {transform_indices = @transform_2, window_bounds = array<i64: 16, 128>}]} {
    %c0 = arith.constant 0 : index
    %c0_0 = arith.constant 0 : index
    %0 = memref.load %arg1[%c0, %c0_0] : memref<1x1xf32, #tpu.memory_space<smem>>
    %c0_1 = arith.constant 0 : index
    %c0_2 = arith.constant 0 : index
    %1 = vector.load %arg2[%c0_1, %c0_2] : memref<16x128xf32, #tpu.memory_space<vmem>>, vector<16x128xf32>
    %2 = vector.broadcast %0 : f32 to vector<16x128xf32>
    %3 = arith.mulf %1, %2 : vector<16x128xf32>
    %c0_3 = arith.constant 0 : index
    %c0_4 = arith.constant 0 : index
    %4 = vector.load %arg3[%c0_3, %c0_4] : memref<16x128xf32, #tpu.memory_space<vmem>>, vector<16x128xf32>
    tpu.vector_store %arg3[%c0_3, %c0_4], %3 {strides = array<i32>} : memref<16x128xf32, #tpu.memory_space<vmem>>, vector<16x128xf32>,
    return
  }
  func.func @transform_0(%arg0: i32) -> (i32, i32) {
    %c0_i32 = arith.constant 0 : i32
    %c0_i32_0 = arith.constant 0 : i32
    %c0_i32_1 = arith.constant 0 : i32
    return %c0_i32, %c0_i32_0 : i32, i32
  }
  func.func @transform_1(%arg0: i32) -> (i32, i32) {
    %c0_i32 = arith.constant 0 : i32
    %c0_i32_0 = arith.constant 0 : i32
    return %arg0, %c0_i32 : i32, i32
  }
  func.func @transform_2(%arg0: i32) -> (i32, i32) {
    %c0_i32 = arith.constant 0 : i32
    %c0_i32_0 = arith.constant 0 : i32
    return %arg0, %c0_i32 : i32, i32
  }
}

</mosaic_0001>

<bundles_post_ra>
// kernel: tpu_custom_call.1
= control target key start
LH: loop header
LB: loop body
LE: loop exit
PB: predicated region body
PF: predicated region fallthrough
CT: control target
= control target key end

     0   :  { %8 = vsyncpa [#allocation4], 0  ;;  %s128_s0 = inlined_call_operand.<no memory space> [shape: f32[1,1], index: 0, kind: input, shape index: {}]   ;;  %s129_s1 = inlined_call_operand.hbm [shape: f32[16,128], index: 1, kind: input, shape index: {}]   ;;  %s130_s2 = inlined_call_operand.hbm [shape: f32[16,128], index: 2, kind: output, shape index: {}]  }
   0x1   :  { %9 = vsyncpa [#allocation5], 0  ;;  %s100_s9 = smov [#allocation3]  }
   0x2   :  { %s17_s10 = sshll.u32 %s100_s9, 4  ;;  %s18_s10 = int_to_ptr.vmem [resolvable:$true] %s17_s10 }
   0x3   :  { %s64_s11 = scalar_lea.vmem %s18_s10, 256  ;;  %p69_p1 = scmp.lt.s32.totalorder %s18_s10, %s18_s10 }
   0x4   :  { %p65_p0 = scmp.ne.s32.totalorder %s18_s10, %s64_s11  ;;  %p70_p2 = scmp.lt.s32.totalorder %s64_s11, %s64_s11 }
   0x6   :  { %p71_p3 = por %p70_p2, %p69_p1 }
   0x8   :  { %p72_p4 = pnand %p71_p3, %p65_p0 }
   0xa   :  { %75 = shalt.err (!%p72_p4)
}
   0xb   :  { %s101_s12 = smov 128   ;;  %s102_s13 = smov 8  }
   0xc   :  { %23 = dma.hbm_to_vmem [thread:$0]  %s129_s1, 256, %s18_s10, [#allocation4], %s101_s12, %s101_s12, %s102_s13  }
   0xd   :  { %96 = dma.done.wait [#allocation4], 256  }
   0xe   :  { %97 = vsyncadd [#allocation4], 4294967040  ;;  %v30_v0 = vstv %s128_s0  ;;  %s103_s18 = smov [#allocation6]   ;;  %v28_v1 = vld [vmem:[#allocation3] sm:$0xff]  ;;  %v29_v2 = vld [vmem:[#allocation3 + $0x8] sm:$0xff] }
   0xf   :  { %s40_s19 = sshll.u32 %s103_s18, 4  ;;  %v31_v3 = vmul.f32 %v30_v0, %v28_v1  ;;  %v32_v4 = vmul.f32 %v30_v0, %v29_v2  ;;  %s41_s19 = int_to_ptr.vmem [resolvable:$true] %s40_s19 }
  0x10   :  { %s76_s20 = scalar_lea.vmem %s41_s19, 256  ;;  %p81_p6 = scmp.lt.s32.totalorder %s41_s19, %s41_s19 }
  0x11   :  { %33 = vst [vmem:[#allocation6] sm:$0xff] %v31_v3  ;;  %34 = vst [vmem:[#allocation6 + $0x8] sm:$0xff] %v32_v4  ;;  %p77_p5 = scmp.ne.s32.totalorder %s41_s19, %s76_s20  ;;  %p82_p7 = scmp.lt.s32.totalorder %s76_s20, %s76_s20 }
  0x13   :  { %p83_p8 = por %p82_p7, %p81_p6 }
  0x15   :  { %p84_p9 = pnand %p83_p8, %p77_p5 }
  0x17   :  { %87 = shalt.err (!%p84_p9)
}
  0x18   :  { %46 = dma.vmem_to_hbm [thread:$0]  %s41_s19, 256, %s130_s2, [#allocation5], %s101_s12, %s101_s12, %s102_s13  }
  0x19   :  { %98 = dma.done.wait [#allocation5], 256  }
  0x1a   :  { %99 = vsyncadd [#allocation5], 4294967040 }
  0x1b   :  { %50 = vsyncpa [#allocation4], 1 }
  0x1c   :  { %51 = vsyncpa [#allocation5], 1 }

</bundles_post_ra>
